<compile_context>
chip_gen: v7x
topology: tpu7x:2x2x1
jax: 0.10.0
libtpu: 0.0.40
codegen_flags: <defaults>
</compile_context>

<pallas_src>
import math

import jax
import jax.numpy as jnp
from jax.experimental import pallas as pl
from jax.experimental.pallas import tpu as pltpu

_MIB = 1 << 20


def _round_up(x, m):
    return ((x + m - 1) // m) * m


def _pick_tile(extent, max_tile, align):
    """Largest multiple of `align` <= max_tile that divides `extent` exactly."""
    t = min(max_tile, extent)
    t = (t // align) * align
    while t > align and extent % t != 0:
        t -= align
    return max(t, align)


def _default_tile_caps():
    """Per-generation tile caps so the K loop is MXU-bound, not DMA-bound."""
    kind = ""
    try:
        kind = jax.devices()[0].device_kind.lower()
    except Exception:  # pragma: no cover - defensive, host-side only
        pass
    if "v6" in kind:
        # v6e needs ~650 FLOPs/byte (918 TF/s vs 1.4 TB/s): (1024, 2048) -> ~683.
        return 1024, 2048, 1024
    # v5e (~240 FLOPs/byte) and v7x (~310): (512, 1024) -> ~341, ~10-12 MiB VMEM.
    return 512, 1024, 1024


# ----------------------------------------------------------------------------
# Kernels
# ----------------------------------------------------------------------------
def _linear_cast_acc_kernel(x_ref, w_ref, b_ref, o_ref, acc_ref):
    """(M, N, K)-tiled: f32 accumulator resident over K, epilogue on last step."""
    k = pl.program_id(2)

    @pl.when(k == 0)
    def _():
        acc_ref[...] = jnp.zeros_like(acc_ref)

    acc_ref[...] += jnp.dot(x_ref[...].astype(w_ref.dtype), w_ref[...],
                            preferred_element_type=jnp.float32)

    @pl.when(k == pl.num_programs(2) - 1)
    def _():
        # Bias add (f32) + the ToDTypeWrapper cast happen exactly once.
        o_ref[...] = (acc_ref[...] + b_ref[...]).astype(o_ref.dtype)


def _linear_cast_ws_kernel(x_ref, w_ref, b_ref, o_ref):
    """Weight-stationary: full-K dot, no accumulator scratch, direct epilogue."""
    acc = jnp.dot(x_ref[...].astype(w_ref.dtype), w_ref[...],
                  preferred_element_type=jnp.float32)
    o_ref[...] = (acc + b_ref[...]).astype(o_ref.dtype)


# ----------------------------------------------------------------------------
# Factory: hoists the constant weight/bias prep out of the per-call forward.
# ----------------------------------------------------------------------------
def make_to_dtype_linear(w, b, out_dtype=jnp.bfloat16,
                         compute_dtype=jnp.bfloat16,
                         tm_max=None, tn_max=None, tk_max=None,
                         ws_weight_bytes_max=8 * _MIB):
    """Returns forward(x) = (x @ w + b).astype(out_dtype).

    w: [K, N]  (transpose of torch nn.Linear's [out, in] weight)
    b: [N]
    compute_dtype: matmul operand dtype (bf16 for MXU rate; f32 for a
      bit-faithful nn.Linear).  Accumulation/bias-add are always f32.
    """
    K, N = w.shape
    caps = _default_tile_caps()
    tm_max = caps[0] if tm_max is None else tm_max
    tn_max = caps[1] if tn_max is None else tn_max
    tk_max = caps[2] if tk_max is None else tk_max

    K_pad = _round_up(K, 128)
    N_pad = _round_up(N, 128)
    tk = _pick_tile(K_pad, tk_max, 128)
    tn = _pick_tile(N_pad, tn_max, 128)

    w_itemsize = jnp.dtype(compute_dtype).itemsize
    out_itemsize = jnp.dtype(out_dtype).itemsize

    # Pad + cast the constant weight/bias ONCE, not on every forward call.
    w_p = jnp.zeros((K_pad, N_pad), compute_dtype).at[:K, :N].set(
        w.astype(compute_dtype))
    b_p = jnp.zeros((1, N_pad), jnp.float32).at[:, :N].set(
        b.reshape(1, N).astype(jnp.float32))

    weight_bytes = K_pad * N_pad * w_itemsize
    # Weight-stationary fast path: whole W resident in VMEM, W read from HBM
    # exactly once, no K grid axis, no accumulator scratch.
    use_ws = weight_bytes <= ws_weight_bytes_max

    @jax.jit
    def forward(x):
        orig_shape = x.shape
        assert orig_shape[-1] == K, "input feature dim mismatch"
        M = math.prod(orig_shape[:-1]) if len(orig_shape) > 1 else 1
        x2 = x.reshape(M, K)

        tm = min(tm_max, _round_up(M, 16))  # 16: bf16 sublane packing
        M_pad = _round_up(M, tm)

        need_x_pad = (M_pad != M) or (K_pad != K)
        if need_x_pad:
            # K tail MUST be zero for a correct dot; fuse pad + cast in one
            # pass so the kernel re-reads 2 B/elem instead of 4.
            xk = jnp.zeros((M_pad, K_pad), compute_dtype).at[:M, :K].set(
                x2.astype(compute_dtype))
        else:
            # Already aligned: no extra HBM pass; cast inside the kernel.
            xk = x2
        x_itemsize = jnp.dtype(xk.dtype).itemsize

        if use_ws:
            grid = (M_pad // tm,)
            vmem_bytes = (2 * weight_bytes
                          + 2 * tm * K_pad * x_itemsize
                          + 2 * tm * N_pad * out_itemsize
                          + 2 * N_pad * 4)
            cost = pl.CostEstimate(
                flops=2 * M_pad * N_pad * K_pad,
                transcendentals=0,
                bytes_accessed=(M_pad * K_pad * x_itemsize + weight_bytes
                                + M_pad * N_pad * out_itemsize + N_pad * 4))
            out = pl.pallas_call(
                _linear_cast_ws_kernel,
                out_shape=jax.ShapeDtypeStruct((M_pad, N_pad), out_dtype),
                grid=grid,
                in_specs=[
                    pl.BlockSpec((tm, K_pad), lambda i: (i, 0)),
                    pl.BlockSpec((K_pad, N_pad), lambda i: (0, 0)),  # resident W
                    pl.BlockSpec((1, N_pad), lambda i: (0, 0)),
                ],
                out_specs=pl.BlockSpec((tm, N_pad), lambda i: (i, 0)),
                compiler_params=pltpu.CompilerParams(
                    dimension_semantics=("parallel",),
                    vmem_limit_bytes=int(min(max(32 * _MIB,
                                                 vmem_bytes + 8 * _MIB),
                                             100 * _MIB))),
                cost_estimate=cost,
            )(xk, w_p, b_p)
        else:
            grid = (M_pad // tm, N_pad // tn, K_pad // tk)
            vmem_bytes = (2 * tm * tk * x_itemsize
                          + 2 * tk * tn * w_itemsize
                          + 2 * tm * tn * out_itemsize
                          + 2 * tn * 4
                          + tm * tn * 4)  # f32 accumulator
            cost = pl.CostEstimate(
                flops=2 * M_pad * N_pad * K_pad,
                transcendentals=0,
                bytes_accessed=((N_pad // tn) * M_pad * K_pad * x_itemsize
                                + (M_pad // tm) * K_pad * N_pad * w_itemsize
                                + M_pad * N_pad * out_itemsize
                                + (M_pad // tm) * N_pad * 4))
            out = pl.pallas_call(
                _linear_cast_acc_kernel,
                out_shape=jax.ShapeDtypeStruct((M_pad, N_pad), out_dtype),
                grid=grid,
                in_specs=[
                    pl.BlockSpec((tm, tk), lambda i, j, k: (i, k)),
                    pl.BlockSpec((tk, tn), lambda i, j, k: (k, j)),
                    pl.BlockSpec((1, tn), lambda i, j, k: (0, j)),
                ],
                out_specs=pl.BlockSpec((tm, tn), lambda i, j, k: (i, j)),
                scratch_shapes=[pltpu.VMEM((tm, tn), jnp.float32)],
                compiler_params=pltpu.CompilerParams(
                    dimension_semantics=("parallel", "parallel", "arbitrary"),
                    vmem_limit_bytes=int(min(max(32 * _MIB,
                                                 vmem_bytes + 8 * _MIB),
                                             100 * _MIB))),
                cost_estimate=cost,
            )(xk, w_p, b_p)

        if (M_pad != M) or (N_pad != N):
            out = out[:M, :N]
        return out.reshape(*orig_shape[:-1], N)

    return forward


if __name__ == "__main__":
    key = jax.random.PRNGKey(0)
    kx, kw, kb = jax.random.split(key, 3)

    B, S, H = 2, 8, 32
    x = jax.random.normal(kx, (B, S, H), dtype=jnp.float32)

    # Deterministic synthetic "nn.Linear(H, H)" parameters.  nn.Linear stores
    # weight as [out, in]; the kernel wants [in, out], so pass the transpose.
    bound = 1.0 / (H ** 0.5)
    w_linear = jax.random.uniform(kw, (H, H), minval=-bound, maxval=bound,
                                  dtype=jnp.float32)          # [out, in]
    b_linear = jax.random.uniform(kb, (H,), minval=-bound, maxval=bound,
                                  dtype=jnp.float32)

    # Constant weight prep (pad + cast) happens once, here.
    forward = make_to_dtype_linear(w_linear.T, b_linear, out_dtype=jnp.bfloat16)

    y = jax.block_until_ready(forward(x))

    # Reference: f32 linear, then the ToDTypeWrapper cast.
    y_ref = (x.reshape(-1, H) @ w_linear.T + b_linear).astype(
        jnp.bfloat16).reshape(B, S, H)
    assert y.shape == (B, S, H)
    assert y.dtype == jnp.bfloat16
    # bf16 matmul operands vs f32 reference -> bf16-level tolerance.
    assert jnp.allclose(y.astype(jnp.float32), y_ref.astype(jnp.float32),
                        atol=3e-2, rtol=3e-2)

    print("KERNEL_OK")
</pallas_src>

<mosaic_0001>
module attributes {stable_mosaic.version = 11 : i64} {
  func.func @_linear_cast_ws_kernel(%arg0: i32, %arg1: memref<16x128xbf16, #tpu.memory_space<vmem>>, %arg2: memref<128x128xbf16, #tpu.memory_space<vmem>>, %arg3: memref<1x128xf32, #tpu.memory_space<vmem>>, %arg4: memref<16x128xbf16, #tpu.memory_space<vmem>>) attributes {dimension_semantics = [#tpu.dimension_semantics<parallel>], iteration_bounds = array<i64: 1>, scalar_prefetch = 0 : i64, scratch_operands = 0 : i64, tpu.core_type = #tpu.core_type<tc>, window_params = [{transform_indices = @transform_0, window_bounds = array<i64: 16, 128>}, {pipeline_mode = #tpu.pipeline_mode<synchronous>, transform_indices = @transform_1, window_bounds = array<i64: 128, 128>}, {pipeline_mode = #tpu.pipeline_mode<synchronous>, transform_indices = @transform_2, window_bounds = array<i64: 1, 128>}, {transform_indices = @transform_3, window_bounds = array<i64: 16, 128>}]} {
    %c0 = arith.constant 0 : index
    %c0_0 = arith.constant 0 : index
    %0 = vector.load %arg1[%c0, %c0_0] : memref<16x128xbf16, #tpu.memory_space<vmem>>, vector<16x128xbf16>
    %c0_1 = arith.constant 0 : index
    %c0_2 = arith.constant 0 : index
    %1 = vector.load %arg2[%c0_1, %c0_2] : memref<128x128xbf16, #tpu.memory_space<vmem>>, vector<128x128xbf16>
    %cst = arith.constant dense<0.000000e+00> : vector<16x128xf32>
    %2 = tpu.matmul %0, %1, %cst {dimension_numbers = #tpu.dot_dimension_numbers<[1], [0], [0], [1], [0, 0, 1, 1], [], []>} : vector<16x128xbf16>, vector<128x128xbf16>, vector<16x128xf32> -> vector<16x128xf32>
    %c0_3 = arith.constant 0 : index
    %c0_4 = arith.constant 0 : index
    %3 = vector.load %arg3[%c0_3, %c0_4] : memref<1x128xf32, #tpu.memory_space<vmem>>, vector<1x128xf32>
    %4 = vector.broadcast %3 : vector<1x128xf32> to vector<16x128xf32>
    %5 = arith.addf %2, %4 : vector<16x128xf32>
    %6 = arith.truncf %5 : vector<16x128xf32> to vector<16x128xbf16>
    %c0_5 = arith.constant 0 : index
    %c0_6 = arith.constant 0 : index
    %7 = vector.load %arg4[%c0_5, %c0_6] : memref<16x128xbf16, #tpu.memory_space<vmem>>, vector<16x128xbf16>
    tpu.vector_store %arg4[%c0_5, %c0_6], %6 {strides = array<i32>} : memref<16x128xbf16, #tpu.memory_space<vmem>>, vector<16x128xbf16>,
    return
  }
  func.func @transform_0(%arg0: i32) -> (i32, i32) {
    %c0_i32 = arith.constant 0 : i32
    %c0_i32_0 = arith.constant 0 : i32
    return %arg0, %c0_i32 : i32, i32
  }
  func.func @transform_1(%arg0: i32) -> (i32, i32) {
    %c0_i32 = arith.constant 0 : i32
    %c0_i32_0 = arith.constant 0 : i32
    %c0_i32_1 = arith.constant 0 : i32
    return %c0_i32, %c0_i32_0 : i32, i32
  }
  func.func @transform_2(%arg0: i32) -> (i32, i32) {
    %c0_i32 = arith.constant 0 : i32
    %c0_i32_0 = arith.constant 0 : i32
    %c0_i32_1 = arith.constant 0 : i32
    return %c0_i32, %c0_i32_0 : i32, i32
  }
  func.func @transform_3(%arg0: i32) -> (i32, i32) {
    %c0_i32 = arith.constant 0 : i32
    %c0_i32_0 = arith.constant 0 : i32
    return %arg0, %c0_i32 : i32, i32
  }
}

</mosaic_0001>

<bundles_post_ra>
// kernel: forward.1
= control target key start
LH: loop header
LB: loop body
LE: loop exit
PB: predicated region body
PF: predicated region fallthrough
CT: control target
= control target key end

     0   :  { %8 = vsyncpa [#allocation3], 0  ;;  %s250_s12 = smov [#allocation2]   ;;  %s296_s0 = inlined_call_operand.vmem [shape: bf16[16,128], index: 0, kind: input, shape index: {}]   ;;  %s297_s1 = inlined_call_operand.hbm [shape: bf16[128,128], index: 1, kind: input, shape index: {}]   ;;  %s298_s2 = inlined_call_operand.vmem [shape: f32[1,128], index: 2, kind: input, shape index: {}]   ;;  %s299_s3 = inlined_call_operand.vmem [shape: bf16[16,128], index: 3, kind: output, shape index: {}]  }
   0x1   :  { %s16_s13 = sshll.u32 %s250_s12, 4  ;;  %s226_s16 = scalar_lea.hbm %s297_s1, 1024  ;;  %s17_s13 = int_to_ptr.vmem [resolvable:$true] %s16_s13 }
   0x2   :  { %p227_p0 = scmp.ne.s32.totalorder %s297_s1, %s226_s16  ;;  %p230_p1 = scmp.lt.u32.totalorder %s226_s16, %s297_s1 }
   0x4   :  { %p232_p2 = pnand %p230_p1, %p227_p0 }
   0x6   :  { %235 = shalt.err (!%p232_p2)
}
   0x7   :  { %s236_s21 = scalar_lea.vmem %s17_s13, 1024  ;;  %p241_p4 = scmp.lt.s32.totalorder %s17_s13, %s17_s13 }
   0x8   :  { %p237_p3 = scmp.ne.s32.totalorder %s17_s13, %s236_s21  ;;  %p242_p5 = scmp.lt.s32.totalorder %s236_s21, %s236_s21 }
   0xa   :  { %p243_p6 = por %p242_p5, %p241_p4 }
   0xc   :  { %p244_p7 = pnand %p243_p6, %p237_p3 }
   0xe   :  { %247 = shalt.err (!%p244_p7)
}
   0xf   :  { %s251_s22 = smov 64   ;;  %s252_s23 = smov 4  }
  0x10   :  { %22 = dma.hbm_to_vmem [thread:$0]  %s297_s1, 1024, %s17_s13, [#allocation3], %s251_s22, %s251_s22, %s252_s23  }
  0x11   :  { %248 = dma.done.wait [#allocation3], 1024  }
  0x12   :  { %249 = vsyncadd [#allocation3], 4294966272  ;;  %v253_v0 = vmov 0.0   ;;  %vm254_vm0 = vmmov 0   ;;  %v217_v1 = vld [vmem:[#allocation2] sm:$0xff]   ;;  %v218_v2 = vld [vmem:[#allocation2 + $0x8] sm:$0xff]  }
  0x13   :  { %192 = vmatprep.subr.bf16.mxu0 %v253_v0  ;;  %208 = vmatprep.mubr.msk.bf16.mxu0 %vm254_vm0, %v253_v0  ;;  %v219_v3 = vld [vmem:[#allocation2 + $0x10] sm:$0xff]   ;;  %v220_v4 = vld [vmem:[#allocation2 + $0x18] sm:$0xff]   ;;  %v221_v5 = vld [vmem:[#allocation2 + $0x20] sm:$0xff]  }
  0x14   :  { %193 = vmatpush3.bf16.msra.mxu0 %v217_v1  ;;  %v222_v6 = vld [vmem:[#allocation2 + $0x28] sm:$0xff]   ;;  %v223_v7 = vld [vmem:[#allocation2 + $0x30] sm:$0xff]   ;;  %v224_v8 = vld [vmem:[#allocation2 + $0x38] sm:$0xff]  }
  0x15   :  { %194 = vmatprep.subr.bf16.mxu0 %v253_v0  ;;  %v225_v9 = vld [vmem:[%s296_s0] sm:$0xff]  }
  0x16   :  { %v164_v10 = vld [vmem:[%s298_s2] ss:$0 sm:$0xff] }
  0x18   :  { %195 = vmatpush3.bf16.msra.mxu0 %v218_v2 }
  0x19   :  { %196 = vmatprep.subr.bf16.mxu0 %v253_v0 }
  0x1c   :  { %197 = vmatpush3.bf16.msra.mxu0 %v219_v3 }
  0x1d   :  { %198 = vmatprep.subr.bf16.mxu0 %v253_v0 }
  0x20   :  { %199 = vmatpush3.bf16.msra.mxu0 %v220_v4 }
  0x21   :  { %200 = vmatprep.subr.bf16.mxu0 %v253_v0 }
  0x24   :  { %201 = vmatpush3.bf16.msra.mxu0 %v221_v5 }
  0x25   :  { %202 = vmatprep.subr.bf16.mxu0 %v253_v0 }
  0x28   :  { %203 = vmatpush3.bf16.msra.mxu0 %v222_v6 }
  0x29   :  { %204 = vmatprep.subr.bf16.mxu0 %v253_v0 }
  0x2c   :  { %205 = vmatpush3.bf16.msra.mxu0 %v223_v7 }
  0x2d   :  { %206 = vmatprep.subr.bf16.mxu0 %v253_v0 }
  0x30   :  { %207 = vmatpush3.bf16.msra.mxu0 %v224_v8 }
  0x33   :  { %209 = vmatmul.mubr.bf16.vlgmr.msra.gmra.mrb[0].mxu0 %v225_v9 }
 0x106   :  { %v142_v11 = vpop.f32.mrb[0].mxu0 }
 0x107   :  { %v210_v12 = vpop.f32.mrb[1].mxu0  ;;  %v143_v14 = vadd.f32 %v164_v10, %v142_v11 }
 0x108   :  { %v145_v13 = vpop.f32.mrb[2].mxu0 }
 0x109   :  { %v146_v15 = vadd.f32 %v164_v10, %v145_v13  ;;  %v211_v16 = vpop.f32.mrb[3].mxu0 }
 0x10b   :  { %v181_v17 = vpack.c.bf16 %v146_v15, %v143_v14 }
 0x10d   :  { %182 = vst [vmem:[%s299_s3] sm:$0xff] %v181_v17  }
 0x10e   :  { %163 = vsyncpa [#allocation3], 1 }

</bundles_post_ra>
